<compile_context>
chip_gen: v7x
topology: tpu7x:2x2x1
jax: 0.10.0
libtpu: 0.0.40
codegen_flags: <defaults>
</compile_context>

<pallas_src>
import functools
import math

import jax
import jax.numpy as jnp
from jax.experimental import pallas as pl
from jax.experimental.pallas import tpu as pltpu


def _choose_block_b(batch, num_classes, in_itemsize):
    """Pick the largest batch tile that keeps VMEM use conservative on all chips."""
    # Per row: 2x input tile (double-buffered) + ~4 live f32 (TB, C) temporaries.
    bytes_per_row = num_classes * (2 * in_itemsize + 4 * 4)
    budget = 28 * 1024 * 1024          # fits v7x (64 MiB physical VMEM) comfortably
    cap = max(16, budget // max(bytes_per_row, 1))
    cap = min(cap, 4096)               # gains flatten out well before this
    cap = max(16, (cap // 16) * 16)    # sublane packing (covers bf16's 16-row packs)
    if batch <= cap:
        return int(batch)              # single (or few) full blocks, no padding games
    return int(cap)


def _label_smoothing_kernel(logits_ref, target_ref, out_ref, *,
                            smooth_value, confidence, h_const, lse_coef):
    x = logits_ref[...].astype(jnp.float32)            # (TB, C), cast in-kernel
    tgt = target_ref[...]                               # (TB, 1) int32
    tb, c = x.shape

    # Stable log-softmax pieces.
    m = jnp.max(x, axis=-1, keepdims=True)               # (TB, 1)
    shifted = x - m                                       # (TB, C)
    lse = jnp.log(jnp.sum(jnp.exp(shifted), axis=-1, keepdims=True))   # (TB, 1)

    # sum_j t_j * (log t_j - log_p_j)  with  t_j = smooth_value + confidence*[j==tgt]
    #   = H_const - smooth_value * sum_j log_p_j - confidence * log_p_{tgt}
    # and log_p_j = shifted_j - lse, so only two row-sums over the class axis remain.
    sum_shifted = jnp.sum(shifted, axis=-1, keepdims=True)              # (TB, 1)
    classes = jax.lax.broadcasted_iota(jnp.int32, (tb, c), 1)
    shifted_at_t = jnp.sum(jnp.where(classes == tgt, shifted, 0.0),
                           axis=-1, keepdims=True)                       # (TB, 1)

    per_sample = (h_const
                  - smooth_value * sum_shifted
                  - confidence * shifted_at_t
                  + lse_coef * lse)                                      # (TB, 1)

    out_ref[...] = per_sample


def label_smoothing_loss(logits, target, num_classes, smoothing=0.1,
                         reduction="mean", block_b=None):
    if not 0 <= smoothing < 1:
        raise ValueError("Smoothing parameter must be in [0, 1).")
    if reduction not in ("mean", "sum", "none"):
        raise ValueError("Unsupported reduction type.")

    B, C = logits.shape
    assert C == num_classes

    confidence = 1.0 - smoothing
    smooth_value = smoothing / (num_classes - 1) if num_classes > 1 else 0.0
    hot_t = confidence + smooth_value
    # Python-time constants of the simplified KL (guard log(0) when smoothing=0).
    h_const = 0.0
    if smooth_value > 0.0:
        h_const += (num_classes - 1) * smooth_value * math.log(smooth_value)
    if hot_t > 0.0:
        h_const += hot_t * math.log(hot_t)
    lse_coef = smooth_value * num_classes + confidence

    if block_b is None:
        block_b = _choose_block_b(B, C, jnp.dtype(logits.dtype).itemsize)
    nb = pl.cdiv(B, block_b)

    # Targets as (B, 1) int32; logits stay in their original dtype (no wrapper cast).
    target2d = target.reshape(B, 1).astype(jnp.int32)

    kernel = functools.partial(
        _label_smoothing_kernel,
        smooth_value=float(smooth_value),
        confidence=float(confidence),
        h_const=float(h_const),
        lse_coef=float(lse_coef),
    )

    per_sample = pl.pallas_call(
        kernel,
        out_shape=jax.ShapeDtypeStruct((B, 1), jnp.float32),
        grid_spec=pltpu.PrefetchScalarGridSpec(
            num_scalar_prefetch=0,
            grid=(nb,),
            in_specs=[
                pl.BlockSpec((block_b, C), lambda i: (i, 0)),
                pl.BlockSpec((block_b, 1), lambda i: (i, 0)),
            ],
            out_specs=pl.BlockSpec((block_b, 1), lambda i: (i, 0)),
        ),
        compiler_params=pltpu.CompilerParams(
            # No resident accumulator -> batch axis is embarrassingly parallel
            # (lets v7x shard the grid across its two TensorCores).
            dimension_semantics=("parallel",),
            vmem_limit_bytes=48 * 1024 * 1024,
        ),
    )(logits, target2d)

    per_sample = per_sample.reshape(B)
    if reduction == "none":
        return per_sample
    total = jnp.sum(per_sample)
    return total / B if reduction == "mean" else total


def _reference_loss(logits, target, num_classes, smoothing=0.1, reduction="mean"):
    confidence = 1.0 - smoothing
    smooth_value = smoothing / (num_classes - 1) if num_classes > 1 else 0.0
    one_hot = jax.nn.one_hot(target, num_classes, dtype=jnp.float32)
    smooth_t = one_hot * confidence + smooth_value
    log_probs = jax.nn.log_softmax(logits.astype(jnp.float32), axis=-1)
    pos = smooth_t > 0.0
    safe_t = jnp.where(pos, smooth_t, 1.0)
    kl = jnp.where(pos, smooth_t * (jnp.log(safe_t) - log_probs), 0.0)
    per_sample = jnp.sum(kl, axis=-1)
    if reduction == "mean":
        return per_sample.mean()
    if reduction == "sum":
        return per_sample.sum()
    return per_sample


if __name__ == "__main__":
    B, NUM_CLASSES, SMOOTHING = 16, 32, 0.1

    key = jax.random.PRNGKey(0)
    k_logits, k_target, k_logits2, k_target2 = jax.random.split(key, 4)
    logits = jax.random.normal(k_logits, (B, NUM_CLASSES), dtype=jnp.float32)
    target = jax.random.randint(k_target, (B,), 0, NUM_CLASSES, dtype=jnp.int32)

    # All three reductions, f32 inputs.
    for reduction in ("mean", "sum", "none"):
        out = jax.block_until_ready(
            label_smoothing_loss(logits, target, NUM_CLASSES,
                                 smoothing=SMOOTHING, reduction=reduction))
        ref = _reference_loss(logits, target, NUM_CLASSES,
                              smoothing=SMOOTHING, reduction=reduction)
        assert jnp.allclose(out, ref, atol=1e-5, rtol=1e-4), (reduction, out, ref)

    # bf16 inputs pass straight through (no wrapper f32 cast).
    logits_bf16 = logits.astype(jnp.bfloat16)
    out_bf16 = jax.block_until_ready(
        label_smoothing_loss(logits_bf16, target, NUM_CLASSES,
                             smoothing=SMOOTHING, reduction="mean"))
    ref_bf16 = _reference_loss(logits_bf16, target, NUM_CLASSES,
                               smoothing=SMOOTHING, reduction="mean")
    assert jnp.allclose(out_bf16, ref_bf16, atol=1e-4, rtol=1e-4), (out_bf16, ref_bf16)

    # smoothing = 0 exercises the log(0) guard (reduces to plain NLL).
    out_s0 = jax.block_until_ready(
        label_smoothing_loss(logits, target, NUM_CLASSES,
                             smoothing=0.0, reduction="mean"))
    ref_s0 = _reference_loss(logits, target, NUM_CLASSES,
                             smoothing=0.0, reduction="mean")
    assert jnp.allclose(out_s0, ref_s0, atol=1e-5, rtol=1e-4), (out_s0, ref_s0)

    # Ragged batch (B not a multiple of block_b) exercises the cdiv grid and
    # Pallas' masked boundary-block writeback.
    B2 = 13
    logits2 = jax.random.normal(k_logits2, (B2, NUM_CLASSES), dtype=jnp.float32)
    target2 = jax.random.randint(k_target2, (B2,), 0, NUM_CLASSES, dtype=jnp.int32)
    out2 = jax.block_until_ready(
        label_smoothing_loss(logits2, target2, NUM_CLASSES,
                             smoothing=SMOOTHING, reduction="mean", block_b=8))
    ref2 = _reference_loss(logits2, target2, NUM_CLASSES,
                           smoothing=SMOOTHING, reduction="mean")
    assert jnp.allclose(out2, ref2, atol=1e-5, rtol=1e-4), (out2, ref2)

    print("KERNEL_OK")
</pallas_src>

<mosaic_0001>
module attributes {stable_mosaic.version = 11 : i64} {
  func.func @_label_smoothing_kernel(%arg0: i32, %arg1: memref<16x32xf32, #tpu.memory_space<vmem>>, %arg2: memref<16x1xi32, #tpu.memory_space<vmem>>, %arg3: memref<16x1xf32, #tpu.memory_space<vmem>>) attributes {dimension_semantics = [#tpu.dimension_semantics<parallel>], iteration_bounds = array<i64: 1>, scalar_prefetch = 0 : i64, scratch_operands = 0 : i64, tpu.core_type = #tpu.core_type<tc>, window_params = [{transform_indices = @transform_0, window_bounds = array<i64: 16, 32>}, {transform_indices = @transform_1, window_bounds = array<i64: 16, 1>}, {transform_indices = @transform_2, window_bounds = array<i64: 16, 1>}]} {
    %c0 = arith.constant 0 : index
    %c0_0 = arith.constant 0 : index
    %0 = vector.load %arg1[%c0, %c0_0] : memref<16x32xf32, #tpu.memory_space<vmem>>, vector<16x32xf32>
    %c0_1 = arith.constant 0 : index
    %c0_2 = arith.constant 0 : index
    %1 = vector.load %arg2[%c0_1, %c0_2] : memref<16x1xi32, #tpu.memory_space<vmem>>, vector<16x1xi32>
    %cst = arith.constant dense<0xFF800000> : vector<16xf32>
    %2 = vector.multi_reduction <maximumf>, %0, %cst [1] : vector<16x32xf32> to vector<16xf32>
    %3 = vector.shape_cast %2 : vector<16xf32> to vector<16x1xf32>
    %4 = vector.broadcast %3 : vector<16x1xf32> to vector<16x32xf32>
    %5 = arith.subf %0, %4 : vector<16x32xf32>
    %6 = math.exp %5 : vector<16x32xf32>
    %cst_3 = arith.constant dense<0.000000e+00> : vector<16xf32>
    %7 = vector.multi_reduction <add>, %6, %cst_3 [1] : vector<16x32xf32> to vector<16xf32>
    %8 = vector.shape_cast %7 : vector<16xf32> to vector<16x1xf32>
    %9 = math.log %8 : vector<16x1xf32>
    %cst_4 = arith.constant dense<0.000000e+00> : vector<16xf32>
    %10 = vector.multi_reduction <add>, %5, %cst_4 [1] : vector<16x32xf32> to vector<16xf32>
    %11 = vector.shape_cast %10 : vector<16xf32> to vector<16x1xf32>
    %12 = tpu.iota {dimensions = array<i32: 1>} : vector<16x32xi32>
    %13 = vector.broadcast %1 : vector<16x1xi32> to vector<16x32xi32>
    %14 = arith.cmpi eq, %12, %13 : vector<16x32xi32>
    %cst_5 = arith.constant 0.000000e+00 : f32
    %15 = vector.broadcast %cst_5 : f32 to vector<16x32xf32>
    %16 = arith.select %14, %5, %15 : vector<16x32xi1>, vector<16x32xf32>
    %cst_6 = arith.constant dense<0.000000e+00> : vector<16xf32>
    %17 = vector.multi_reduction <add>, %16, %cst_6 [1] : vector<16x32xf32> to vector<16xf32>
    %18 = vector.shape_cast %17 : vector<16xf32> to vector<16x1xf32>
    %cst_7 = arith.constant 0.0032258064 : f32
    %19 = vector.broadcast %cst_7 : f32 to vector<16x1xf32>
    %20 = arith.mulf %19, %11 : vector<16x1xf32>
    %cst_8 = arith.constant -0.665589988 : f32
    %21 = vector.broadcast %cst_8 : f32 to vector<16x1xf32>
    %22 = arith.subf %21, %20 : vector<16x1xf32>
    %cst_9 = arith.constant 0.899999976 : f32
    %23 = vector.broadcast %cst_9 : f32 to vector<16x1xf32>
    %24 = arith.mulf %23, %18 : vector<16x1xf32>
    %25 = arith.subf %22, %24 : vector<16x1xf32>
    %cst_10 = arith.constant 1.0032258 : f32
    %26 = vector.broadcast %cst_10 : f32 to vector<16x1xf32>
    %27 = arith.mulf %26, %9 : vector<16x1xf32>
    %28 = arith.addf %25, %27 : vector<16x1xf32>
    %c0_11 = arith.constant 0 : index
    %c0_12 = arith.constant 0 : index
    %29 = vector.load %arg3[%c0_11, %c0_12] : memref<16x1xf32, #tpu.memory_space<vmem>>, vector<16x1xf32>
    tpu.vector_store %arg3[%c0_11, %c0_12], %28 {strides = array<i32>} : memref<16x1xf32, #tpu.memory_space<vmem>>, vector<16x1xf32>,
    return
  }
  func.func @transform_0(%arg0: i32) -> (i32, i32) {
    %c0_i32 = arith.constant 0 : i32
    %c0_i32_0 = arith.constant 0 : i32
    return %arg0, %c0_i32 : i32, i32
  }
  func.func @transform_1(%arg0: i32) -> (i32, i32) {
    %c0_i32 = arith.constant 0 : i32
    %c0_i32_0 = arith.constant 0 : i32
    return %arg0, %c0_i32 : i32, i32
  }
  func.func @transform_2(%arg0: i32) -> (i32, i32) {
    %c0_i32 = arith.constant 0 : i32
    %c0_i32_0 = arith.constant 0 : i32
    return %arg0, %c0_i32 : i32, i32
  }
}

</mosaic_0001>

<bundles_post_ra>
// kernel: tpu_custom_call.1
= control target key start
LH: loop header
LB: loop body
LE: loop exit
PB: predicated region body
PF: predicated region fallthrough
CT: control target
= control target key end

     0   :  { %vm15_vm0 = vcmask 261120   ;;  %v92_v2 = vmov 0   ;;  %v44_v13 = vlaneseq  ;;  %vm74_vm3 = vcmask 7168   ;;  %s134_s0 = inlined_call_operand.vmem [shape: f32[16,32], index: 0, kind: input, shape index: {}]   ;;  %s135_s1 = inlined_call_operand.vmem [shape: s32[16,1], index: 1, kind: input, shape index: {}]   ;;  %s136_s2 = inlined_call_operand.vmem [shape: f32[16,1], index: 2, kind: output, shape index: {}]  }
   0x1   :  { %v11_v0 = vld [vmem:[%s134_s0] sm:$0xff]  ;;  %v12_v1 = vld [vmem:[%s134_s0 + $0x8] sm:$0xff]  ;;  %82 = vset.pattern.permute.xlu1 %v92_v2  ;;  %83 = vset.pattern.permute.xlu0 %v92_v2 }
   0x2   :  { %v13_v3 = vld [vmem:[%s135_s1] sm:$0xff]  ;;  %v16_v4 = vsel %vm15_vm0, %v11_v0, -inf  ;;  %v14_v5 = vld [vmem:[%s135_s1 + $0x8] sm:$0xff]  ;;  %v19_v6 = vsel %vm15_vm0, %v12_v1, -inf  ;;  %v45_v17 = vand.u32 127, %v44_v13 }
   0x3   :  { %47 = vperm.xlu1 %82, %v13_v3   ;;  %17 = vmax.xlane.f32.xlu0 %v16_v4 }
   0x7   :  { %50 = vperm.xlu1 %82, %v14_v5   ;;  %20 = vmax.xlane.f32.xlu0 %v19_v6 }
  0x82   :  { %v48_v16 = vpop.permute.xlu1 %47 }
  0x83   :  { %vm52_vm1 = vcmp.eq.s32.totalorder %v45_v17, %v48_v16 }
  0x86   :  { %v51_v21 = vpop.permute.xlu1 %50 }
  0x87   :  { %vm53_vm2 = vcmp.eq.s32.totalorder %v45_v17, %v51_v21 }
  0x90   :  { %v18_v7 = vpop.xlane.xlu0 %17 }
  0x91   :  { %v22_v8 = vsub.f32 %v11_v0, %v18_v7 }
  0x93   :  { %v24_v9 = vmul.f32 1.442695, %v22_v8  ;;  %v38_v19 = vsel %vm15_vm0, %v22_v8, 0.0  ;;  %v54_v23 = vsel %vm52_vm1, %v22_v8, 0.0 }
  0x94   :  { %v21_v10 = vpop.xlane.xlu0 %20  ;;  %v56_v24 = vsel %vm15_vm0, %v54_v23, 0.0 }
  0x95   :  { %84 = vpow2.f32 %v24_v9  ;;  %v23_v11 = vsub.f32 %v12_v1, %v21_v10 }
  0x97   :  { %v26_v12 = vmul.f32 1.442695, %v23_v11  ;;  %v41_v22 = vsel %vm15_vm0, %v23_v11, 0.0  ;;  %v55_v25 = vsel %vm53_vm2, %v23_v11, 0.0 }
  0x98   :  { %v59_v26 = vsel %vm15_vm0, %v55_v25, 0.0 }
  0x99   :  { %86 = vpow2.f32 %v26_v12 }
  0x9f   :  { %v85_v14 = vpop.eup %84 }
  0xa0   :  { %v28_v15 = vsel %vm15_vm0, %v85_v14, 0.0 }
  0xa1   :  { %29 = vadd.xlane.f32.xlu0 %v28_v15 }
  0xa3   :  { %v87_v18 = vpop.eup %86 }
  0xa4   :  { %v31_v20 = vsel %vm15_vm0, %v87_v18, 0.0 }
  0xa5   :  { %39 = vadd.xlane.f32.xlu0 %v38_v19  ;;  %32 = vadd.xlane.f32.xlu1 %v31_v20 }
  0xa9   :  { %42 = vadd.xlane.f32.xlu0 %v41_v22 }
  0xad   :  { %57 = vadd.xlane.f32.xlu0 %v56_v24 }
  0xb1   :  { %60 = vadd.xlane.f32.xlu0 %v59_v26 }
 0x12e   :  { %v30_v27 = vpop.xlane.xlu0 %29 }
 0x12f   :  { %88 = vlog2.f32 %v30_v27 }
 0x132   :  { %v40_v28 = vpop.xlane.xlu0 %39  ;;  %v33_v29 = vpop.xlane.xlu1 %32 }
 0x133   :  { %90 = vlog2.f32 %v33_v29  ;;  %v62_v31 = vmul.f32 0.0032258064, %v40_v28 }
 0x135   :  { %v64_v35 = vsub.f32 -0.66559, %v62_v31 }
 0x136   :  { %v43_v30 = vpop.xlane.xlu0 %42 }
 0x137   :  { %v63_v36 = vmul.f32 0.0032258064, %v43_v30 }
 0x139   :  { %v89_v32 = vpop.eup %88  ;;  %v65_v43 = vsub.f32 -0.66559, %v63_v36 }
 0x13a   :  { %v35_v33 = vmul.f32 0.6931472, %v89_v32  ;;  %v58_v34 = vpop.xlane.xlu0 %57 }
 0x13b   :  { %v66_v37 = vmul.f32 0.9, %v58_v34 }
 0x13c   :  { %v70_v38 = vmul.f32 1.0032258, %v35_v33 }
 0x13d   :  { %v91_v39 = vpop.eup %90  ;;  %v68_v40 = vsub.f32 %v64_v35, %v66_v37 }
 0x13e   :  { %v37_v41 = vmul.f32 0.6931472, %v91_v39  ;;  %v61_v42 = vpop.xlane.xlu0 %60 }
 0x13f   :  { %v72_v44 = vadd.f32 %v70_v38, %v68_v40  ;;  %v67_v45 = vmul.f32 0.9, %v61_v42 }
 0x140   :  { %v71_v46 = vmul.f32 1.0032258, %v37_v41 }
 0x141   :  { %75 = vst.msk [vmem:[%s136_s2] sm:$0xff] %vm74_vm3, %v72_v44  ;;  %v69_v47 = vsub.f32 %v65_v43, %v67_v45 }
 0x143   :  { %v73_v48 = vadd.f32 %v71_v46, %v69_v47 }
 0x145   :  { %76 = vst.msk [vmem:[%s136_s2 + $0x8] sm:$0xff] %vm74_vm3, %v73_v48 }

</bundles_post_ra>
